<compile_context>
chip_gen: v7x
topology: tpu7x:2x2x1
jax: 0.10.0
libtpu: 0.0.40
codegen_flags: <defaults>
</compile_context>

<pallas_src>
import functools

import jax
import jax.numpy as jnp
from jax import lax
from jax.experimental import pallas as pl
from jax.experimental.pallas import tpu as pltpu

LANES = 128
ACC_SUBLANES = 8                          # f32 accumulator vreg tile
_EPS = 1e-12
_VMEM_LIMIT = 32 * 1024 * 1024            # safe on v5e/v6e (128 MiB) and v7x (64 MiB)
_TILE_BYTES_BUDGET = 24 * 1024 * 1024     # double-buffered tile footprint budget


def _round_up(x, m):
    return -(-x // m) * m


def _sublane_tile(*dtypes):
    """Native sublane tile: 8 for 4-byte, 16 for 2-byte, 32 for 1-byte dtypes."""
    t = 8
    for d in dtypes:
        t = max(t, 32 // max(1, jnp.dtype(d).itemsize))
    return t


def _rmse_partial_sum_kernel(t_ref, p_ref, acc_ref, *, valid_rows_last,
                             has_ragged_tail):
    """Accumulates an (8,128) f32 partial sum of (t - p)^2 across the grid."""
    i = pl.program_id(0)

    @pl.when(i == 0)
    def _():
        acc_ref[...] = jnp.zeros_like(acc_ref)

    d = t_ref[...].astype(jnp.float32) - p_ref[...].astype(jnp.float32)
    d2 = d * d

    def _accumulate(x):
        # Sublane-structured partial reduce: (br,128) -> (br//8, 8, 128) -> (8,128).
        acc_ref[...] += x.reshape(-1, ACC_SUBLANES, LANES).sum(axis=0)

    if has_ragged_tail:
        last = pl.num_programs(0) - 1

        @pl.when(i < last)
        def _():
            _accumulate(d2)

        @pl.when(i == last)
        def _():
            # Only the final ragged block pays for the tail mask.
            row_ids = lax.broadcasted_iota(jnp.int32, d2.shape, 0)
            _accumulate(jnp.where(row_ids < valid_rows_last, d2, 0.0))
    else:
        _accumulate(d2)


def _rmse_none_kernel(t_ref, p_ref, o_ref, *, eps):
    """reduction='none': elementwise sqrt((t - p)^2 + eps)."""
    d = t_ref[...].astype(jnp.float32) - p_ref[...].astype(jnp.float32)
    o_ref[...] = jnp.sqrt(d * d + eps).astype(o_ref.dtype)


def rmse_loss(target, pred, reduction="mean", eps=_EPS, block_rows=4096):
    assert target.shape == pred.shape, "target/pred shape mismatch"
    orig_shape = target.shape
    n = target.size
    assert n > 0
    eps = float(eps)

    # Lane-dense 2D packing in the *native* dtype, rounded to the dtype tile.
    sub = _sublane_tile(target.dtype, pred.dtype)
    padded_n = _round_up(n, sub * LANES)
    rows = padded_n // LANES                      # multiple of `sub`

    def to2d(x):
        x = x.reshape(-1)
        if padded_n != n:
            # Only hit for ragged sizes; pads at most sub*128 - 1 elements.
            x = jnp.pad(x, (0, padded_n - n))
        return x.reshape(rows, LANES)

    t2, p2 = to2d(target), to2d(pred)
    in_bytes = t2.dtype.itemsize + p2.dtype.itemsize

    if reduction == "none":
        out_dtype = jnp.result_type(target.dtype, pred.dtype)
        row_bytes = (in_bytes + jnp.dtype(out_dtype).itemsize) * LANES * 2
    elif reduction in ("mean", "sum"):
        out_dtype = None
        row_bytes = in_bytes * LANES * 2
    else:
        raise ValueError(f"unsupported reduction: {reduction}")

    # Block rows: multiple of the dtype tile, within the VMEM tile budget,
    # no larger than the input.
    budget_rows = max(sub, (_TILE_BYTES_BUDGET // row_bytes) // sub * sub)
    br = _round_up(int(block_rows), sub)
    br = min(br, budget_rows, rows)
    total_blocks = -(-rows // br)

    tile = pl.BlockSpec((br, LANES), lambda i: (i, 0))

    if reduction == "none":
        rows_alloc = total_blocks * br            # output exactly tiled
        cost = pl.CostEstimate(
            flops=3 * n,
            transcendentals=n,
            bytes_accessed=n * in_bytes + n * jnp.dtype(out_dtype).itemsize)
        out = pl.pallas_call(
            functools.partial(_rmse_none_kernel, eps=eps),
            out_shape=jax.ShapeDtypeStruct((rows_alloc, LANES), out_dtype),
            grid=(total_blocks,),
            in_specs=[tile, tile],
            out_specs=tile,
            compiler_params=pltpu.CompilerParams(
                dimension_semantics=("parallel",),
                vmem_limit_bytes=_VMEM_LIMIT),
            cost_estimate=cost,
        )(t2, p2)
        if rows_alloc * LANES == n:
            return out.reshape(orig_shape)        # no-copy path (common case)
        return out.reshape(-1)[:n].reshape(orig_shape)

    # mean / sum
    valid_rows_last = rows - (total_blocks - 1) * br
    has_ragged_tail = valid_rows_last != br

    cost = pl.CostEstimate(
        flops=3 * n,
        transcendentals=0,
        bytes_accessed=n * in_bytes + ACC_SUBLANES * LANES * 4)

    partials = pl.pallas_call(
        functools.partial(
            _rmse_partial_sum_kernel,
            valid_rows_last=valid_rows_last,
            has_ragged_tail=has_ragged_tail),
        out_shape=jax.ShapeDtypeStruct((ACC_SUBLANES, LANES), jnp.float32),
        grid=(total_blocks,),
        in_specs=[tile, tile],
        out_specs=pl.BlockSpec((ACC_SUBLANES, LANES), lambda i: (0, 0)),
        compiler_params=pltpu.CompilerParams(
            dimension_semantics=("arbitrary",),
            vmem_limit_bytes=_VMEM_LIMIT),
        cost_estimate=cost,
    )(t2, p2)

    scale = (1.0 / n) if reduction == "mean" else 1.0
    return jnp.sqrt(jnp.sum(partials, dtype=jnp.float32) * scale + eps)


if __name__ == "__main__":
    key = jax.random.PRNGKey(0)
    k1, k2 = jax.random.split(key)
    # Module is shape-agnostic; use an NCHW-style tensor pair.
    target = jax.random.normal(k1, (2, 4, 16, 16), dtype=jnp.float32)
    pred = jax.random.normal(k2, (2, 4, 16, 16), dtype=jnp.float32)

    # reduction='mean' (the usual RMSELoss configuration)
    loss = jax.block_until_ready(rmse_loss(target, pred, reduction="mean"))
    ref = jnp.sqrt(jnp.mean((target - pred) ** 2) + _EPS)
    assert loss.shape == ()
    assert jnp.allclose(loss, ref, rtol=1e-5, atol=1e-6), (loss, ref)

    # reduction='sum'
    loss_sum = jax.block_until_ready(rmse_loss(target, pred, reduction="sum"))
    ref_sum = jnp.sqrt(jnp.sum((target - pred) ** 2) + _EPS)
    assert jnp.allclose(loss_sum, ref_sum, rtol=1e-4, atol=1e-4), (loss_sum, ref_sum)

    # reduction='none'
    loss_none = jax.block_until_ready(rmse_loss(target, pred, reduction="none"))
    ref_none = jnp.sqrt((target - pred) ** 2 + _EPS)
    assert loss_none.shape == target.shape
    assert jnp.allclose(loss_none, ref_none, rtol=1e-5, atol=1e-6)

    print("KERNEL_OK")
</pallas_src>

<mosaic_0001>
module attributes {stable_mosaic.version = 11 : i64} {
  func.func @_rmse_partial_sum_kernel(%arg0: i32, %arg1: memref<16x128xf32, #tpu.memory_space<vmem>>, %arg2: memref<16x128xf32, #tpu.memory_space<vmem>>, %arg3: memref<8x128xf32, #tpu.memory_space<vmem>>) attributes {dimension_semantics = [#tpu.dimension_semantics<arbitrary>], iteration_bounds = array<i64: 1>, scalar_prefetch = 0 : i64, scratch_operands = 0 : i64, tpu.core_type = #tpu.core_type<tc>, window_params = [{transform_indices = @transform_0, window_bounds = array<i64: 16, 128>}, {transform_indices = @transform_1, window_bounds = array<i64: 16, 128>}, {pipeline_mode = #tpu.pipeline_mode<synchronous>, transform_indices = @transform_2, window_bounds = array<i64: 8, 128>}]} {
    %c0_i32 = arith.constant 0 : i32
    %0 = arith.cmpi eq, %arg0, %c0_i32 : i32
    %1 = arith.extui %0 : i1 to i32
    %c0_i32_0 = arith.constant 0 : i32
    %2 = arith.cmpi ne, %1, %c0_i32_0 : i32
    scf.if %2 {
      %cst_8 = arith.constant 0.000000e+00 : f32
      %12 = vector.broadcast %cst_8 : f32 to vector<8x128xf32>
      %c0_9 = arith.constant 0 : index
      %c0_10 = arith.constant 0 : index
      %13 = vector.load %arg3[%c0_9, %c0_10] : memref<8x128xf32, #tpu.memory_space<vmem>>, vector<8x128xf32>
      tpu.vector_store %arg3[%c0_9, %c0_10], %12 {strides = array<i32>} : memref<8x128xf32, #tpu.memory_space<vmem>>, vector<8x128xf32>,
    } else {
    }
    %c0 = arith.constant 0 : index
    %c0_1 = arith.constant 0 : index
    %3 = vector.load %arg1[%c0, %c0_1] : memref<16x128xf32, #tpu.memory_space<vmem>>, vector<16x128xf32>
    %c0_2 = arith.constant 0 : index
    %c0_3 = arith.constant 0 : index
    %4 = vector.load %arg2[%c0_2, %c0_3] : memref<16x128xf32, #tpu.memory_space<vmem>>, vector<16x128xf32>
    %5 = arith.subf %3, %4 : vector<16x128xf32>
    %6 = arith.mulf %5, %5 : vector<16x128xf32>
    %c0_4 = arith.constant 0 : index
    %c0_5 = arith.constant 0 : index
    %7 = vector.load %arg3[%c0_4, %c0_5] : memref<8x128xf32, #tpu.memory_space<vmem>>, vector<8x128xf32>
    %8 = vector.shape_cast %6 : vector<16x128xf32> to vector<2x8x128xf32>
    %cst = arith.constant dense<0.000000e+00> : vector<8x128xf32>
    %9 = vector.multi_reduction <add>, %8, %cst [0] : vector<2x8x128xf32> to vector<8x128xf32>
    %10 = arith.addf %7, %9 : vector<8x128xf32>
    %c0_6 = arith.constant 0 : index
    %c0_7 = arith.constant 0 : index
    %11 = vector.load %arg3[%c0_6, %c0_7] : memref<8x128xf32, #tpu.memory_space<vmem>>, vector<8x128xf32>
    tpu.vector_store %arg3[%c0_6, %c0_7], %10 {strides = array<i32>} : memref<8x128xf32, #tpu.memory_space<vmem>>, vector<8x128xf32>,
    return
  }
  func.func @transform_0(%arg0: i32) -> (i32, i32) {
    %c0_i32 = arith.constant 0 : i32
    %c0_i32_0 = arith.constant 0 : i32
    return %arg0, %c0_i32 : i32, i32
  }
  func.func @transform_1(%arg0: i32) -> (i32, i32) {
    %c0_i32 = arith.constant 0 : i32
    %c0_i32_0 = arith.constant 0 : i32
    return %arg0, %c0_i32 : i32, i32
  }
  func.func @transform_2(%arg0: i32) -> (i32, i32) {
    %c0_i32 = arith.constant 0 : i32
    %c0_i32_0 = arith.constant 0 : i32
    %c0_i32_1 = arith.constant 0 : i32
    return %c0_i32, %c0_i32_0 : i32, i32
  }
}

</mosaic_0001>

<bundles_post_ra>
// kernel: tpu_custom_call.1
= control target key start
LH: loop header
LB: loop body
LE: loop exit
PB: predicated region body
PF: predicated region fallthrough
CT: control target
= control target key end

     0   :  { %7 = vsyncpa [#allocation3], 0  ;;  %s207_s0 = inlined_call_operand.hbm [shape: f32[16,128], index: 0, kind: input, shape index: {}]   ;;  %s208_s1 = inlined_call_operand.hbm [shape: f32[16,128], index: 1, kind: input, shape index: {}]   ;;  %s209_s2 = inlined_call_operand.hbm [shape: f32[8,128], index: 2, kind: output, shape index: {}]  }
   0x1   :  { %8 = vsyncpa [#allocation6], 0 }
   0x2   :  { %9 = vsyncpa [#allocation4], 0  ;;  %s151_s9 = smov [#allocation2]   ;;  %s79_s13 = scalar_lea.hbm %s207_s0, 256 }
   0x3   :  { %s15_s10 = sshll.u32 %s151_s9, 4  ;;  %p80_p0 = scmp.ne.s32.totalorder %s207_s0, %s79_s13  ;;  %s16_s10 = int_to_ptr.vmem [resolvable:$true] %s15_s10 }
   0x4   :  { %p83_p1 = scmp.lt.u32.totalorder %s79_s13, %s207_s0 }
   0x6   :  { %p85_p2 = pnand %p83_p1, %p80_p0 }
   0x8   :  { %88 = shalt.err (!%p85_p2)
}
   0x9   :  { %s89_s18 = scalar_lea.vmem %s16_s10, 256  ;;  %p94_p4 = scmp.lt.s32.totalorder %s16_s10, %s16_s10 }
   0xa   :  { %p90_p3 = scmp.ne.s32.totalorder %s16_s10, %s89_s18  ;;  %p95_p5 = scmp.lt.s32.totalorder %s89_s18, %s89_s18 }
   0xc   :  { %p96_p6 = por %p95_p5, %p94_p4 }
   0xe   :  { %p97_p7 = pnand %p96_p6, %p90_p3 }
  0x10   :  { %100 = shalt.err (!%p97_p7)
}
  0x11   :  { %s152_s19 = smov 128   ;;  %s153_s20 = smov 8  }
  0x12   :  { %21 = dma.hbm_to_vmem [thread:$0]  %s207_s0, 256, %s16_s10, [#allocation3], %s152_s19, %s152_s19, %s153_s20  }
  0x13   :  { %s154_s23 = smov [#allocation5]   ;;  %s101_s27 = scalar_lea.hbm %s208_s1, 256 }
  0x14   :  { %s27_s24 = sshll.u32 %s154_s23, 4  ;;  %p102_p8 = scmp.ne.s32.totalorder %s208_s1, %s101_s27  ;;  %s28_s24 = int_to_ptr.vmem [resolvable:$true] %s27_s24 }
  0x15   :  { %p105_p9 = scmp.lt.u32.totalorder %s101_s27, %s208_s1 }
  0x17   :  { %p107_p10 = pnand %p105_p9, %p102_p8 }
  0x19   :  { %110 = shalt.err (!%p107_p10)
}
  0x1a   :  { %s111_s4 = scalar_lea.vmem %s28_s24, 256  ;;  %p116_p12 = scmp.lt.s32.totalorder %s28_s24, %s28_s24 }
  0x1b   :  { %p112_p11 = scmp.ne.s32.totalorder %s28_s24, %s111_s4  ;;  %p117_p13 = scmp.lt.s32.totalorder %s111_s4, %s111_s4 }
  0x1d   :  { %p118_p0 = por %p117_p13, %p116_p12 }
  0x1f   :  { %p119_p1 = pnand %p118_p0, %p112_p11 }
  0x21   :  { %122 = shalt.err (!%p119_p1)
}
  0x22   :  { %33 = dma.hbm_to_vmem [thread:$0]  %s208_s1, 256, %s28_s24, [#allocation6], %s152_s19, %s152_s19, %s153_s20  }
  0x23   :  { %145 = dma.done.wait [#allocation3], 256  }
  0x24   :  { %146 = vsyncadd [#allocation3], 4294967040 }
  0x25   :  { %147 = dma.done.wait [#allocation6], 256  }
  0x26   :  { %148 = vsyncadd [#allocation6], 4294967040  ;;  %v45_v0 = vld [vmem:[#allocation2] sm:$0xff]  ;;  %v46_v1 = vld [vmem:[#allocation2 + $0x8] sm:$0xff]  ;;  %s155_s6 = smov [#allocation7]  }
  0x27   :  { %v47_v2 = vld [vmem:[#allocation5] sm:$0xff]  ;;  %v48_v3 = vld [vmem:[#allocation5 + $0x8] sm:$0xff]  ;;  %s63_s7 = sshll.u32 %s155_s6, 4  ;;  %s64_s7 = int_to_ptr.vmem [resolvable:$true] %s63_s7 }
  0x28   :  { %v49_v4 = vsub.f32 %v45_v0, %v47_v2  ;;  %v50_v5 = vsub.f32 %v46_v1, %v48_v3  ;;  %s123_s8 = scalar_lea.vmem %s64_s7, 128  ;;  %p128_p3 = scmp.lt.s32.totalorder %s64_s7, %s64_s7 }
  0x29   :  { %p124_p2 = scmp.ne.s32.totalorder %s64_s7, %s123_s8  ;;  %p129_p4 = scmp.lt.s32.totalorder %s123_s8, %s123_s8 }
  0x2a   :  { %v51_v6 = vmul.f32 %v49_v4, %v49_v4  ;;  %v52_v7 = vmul.f32 %v50_v5, %v50_v5 }
  0x2b   :  { %p130_p5 = por %p129_p4, %p128_p3 }
  0x2c   :  { %v54_v8 = vadd.f32 %v52_v7, %v51_v6 }
  0x2d   :  { %p131_p6 = pnand %p130_p5, %p124_p2 }
  0x2e   :  { %56 = vst [vmem:[#allocation7] sm:$0xff] %v54_v8 }
  0x2f   :  { %134 = shalt.err (!%p131_p6)
}
  0x30   :  { %s135_s10 = scalar_lea.hbm %s209_s2, 128 }
  0x31   :  { %p136_p7 = scmp.ne.s32.totalorder %s209_s2, %s135_s10  ;;  %p139_p8 = scmp.lt.u32.totalorder %s135_s10, %s209_s2 }
  0x33   :  { %p141_p9 = pnand %p139_p8, %p136_p7 }
  0x35   :  { %144 = shalt.err (!%p141_p9)
}
  0x36   :  { %66 = dma.vmem_to_hbm [thread:$0]  %s64_s7, 128, %s209_s2, [#allocation4]  }
  0x37   :  { %149 = dma.done.wait [#allocation4], 128  }
  0x38   :  { %150 = vsyncadd [#allocation4], 4294967168 }
  0x39   :  { %70 = vsyncpa [#allocation3], 1 }
  0x3a   :  { %71 = vsyncpa [#allocation6], 1 }
  0x3b   :  { %72 = vsyncpa [#allocation4], 1 }

</bundles_post_ra>
